<compile_context>
chip_gen: v6e
topology: v6e:2x2x1
jax: 0.10.0
libtpu: 0.0.40
codegen_flags: <defaults>
</compile_context>

<pallas_src>
import math

import jax
import jax.numpy as jnp
from jax.experimental import pallas as pl
from jax.experimental.pallas import tpu as pltpu


def _proposal_head_kernel(x_ref, wc_ref, bc_ref, wr_ref, br_ref, cls_ref, reg_ref):
    # x_ref:   (B, C_in, TN)   -- spatial positions lane-dense on the last axis
    # wc_ref:  (C_cls, C_in)   bc_ref: (C_cls, 1)
    # wr_ref:  (C_reg, C_in)   br_ref: (C_reg, 1)
    # cls_ref: (B, C_cls, TN)  reg_ref: (B, C_reg, TN)
    wc = wc_ref[...]
    bc = bc_ref[...]
    wr = wr_ref[...]
    br = br_ref[...]
    batch = x_ref.shape[0]
    for b in range(batch):  # static unroll; B is small and lives inside the block
        x = x_ref[b]  # (C_in, TN)
        cls_ref[b] = (jnp.dot(wc, x, preferred_element_type=jnp.float32) + bc).astype(cls_ref.dtype)
        reg_ref[b] = (jnp.dot(wr, x, preferred_element_type=jnp.float32) + br).astype(reg_ref.dtype)


def _pick_spatial_tile(n):
    # Lane-dense tiles, multiple of 128; full extent if nothing divides evenly
    # (full extent sidesteps the (8,128) divisibility rule).
    for t in (2048, 1024, 512, 256, 128):
        if n % t == 0:
            return t
    return n


def proposal_layer_forward(feature_map, params, *, num_classes, num_yaw, box_dof):
    """feature_map: (B, C_in, ny, nx) float32. Returns (cls_map, reg_map)."""
    w_cls, b_cls, w_reg, b_reg = params
    B, c_in, ny, nx = feature_map.shape
    c_cls = num_classes * num_yaw
    c_reg = num_classes * num_yaw * box_dof
    assert w_cls.shape == (c_cls, c_in) and w_reg.shape == (c_reg, c_in)

    n = ny * nx
    # Free view only (merges trailing dims) — no HBM round-trip transpose.
    x = feature_map.reshape(B, c_in, n)
    bc = b_cls.reshape(c_cls, 1)
    br = b_reg.reshape(c_reg, 1)

    tn = _pick_spatial_tile(n)
    grid = (n // tn,)

    cls_flat, reg_flat = pl.pallas_call(
        _proposal_head_kernel,
        out_shape=(
            jax.ShapeDtypeStruct((B, c_cls, n), jnp.float32),
            jax.ShapeDtypeStruct((B, c_reg, n), jnp.float32),
        ),
        grid_spec=pltpu.PrefetchScalarGridSpec(
            num_scalar_prefetch=0,
            grid=grid,
            in_specs=[
                pl.BlockSpec((B, c_in, tn), lambda i: (0, 0, i)),
                pl.BlockSpec((c_cls, c_in), lambda i: (0, 0)),
                pl.BlockSpec((c_cls, 1), lambda i: (0, 0)),
                pl.BlockSpec((c_reg, c_in), lambda i: (0, 0)),
                pl.BlockSpec((c_reg, 1), lambda i: (0, 0)),
            ],
            out_specs=[
                pl.BlockSpec((B, c_cls, tn), lambda i: (0, 0, i)),
                pl.BlockSpec((B, c_reg, tn), lambda i: (0, 0, i)),
            ],
        ),
        compiler_params=pltpu.CompilerParams(
            # Spatial-tile axis is independent -> megacore-splittable on v7x.
            dimension_semantics=("parallel",),
        ),
    )(x, w_cls, bc, w_reg, br)

    # PyTorch-facing reshapes (wrapper epilogue, layout plumbing only).
    cls_map = cls_flat.reshape(B, num_classes, num_yaw, ny, nx)
    reg_map = reg_flat.reshape(B, num_classes, box_dof, num_yaw, ny, nx)
    reg_map = jnp.transpose(reg_map, (0, 1, 3, 4, 5, 2))
    return cls_map, reg_map


def init_params(key, c_in, num_classes, num_yaw, box_dof):
    # Matches ProposalLayer._init_weights:
    #   conv weights ~ Normal(std=0.01); conv_cls bias = -log(1-0.01)/0.01; conv_reg bias = 0.
    c_cls = num_classes * num_yaw
    c_reg = num_classes * num_yaw * box_dof
    k0, k1 = jax.random.split(key)
    w_cls = jax.random.normal(k0, (c_cls, c_in), jnp.float32) * 0.01  # 1x1 conv kernel squeezed
    w_reg = jax.random.normal(k1, (c_reg, c_in), jnp.float32) * 0.01
    b_cls = jnp.full((c_cls,), -math.log(1.0 - 0.01) / 0.01, jnp.float32)
    b_reg = jnp.zeros((c_reg,), jnp.float32)
    return w_cls, b_cls, w_reg, b_reg


if __name__ == "__main__":
    # cfg: PROPOSAL.C_IN = 4, NUM_CLASSES = 1, NUM_YAW = 2, BOX_DOF = 7
    B, C_IN, NY, NX = 2, 4, 16, 16
    NUM_CLASSES, NUM_YAW, BOX_DOF = 1, 2, 7

    key = jax.random.PRNGKey(0)
    kf, kw = jax.random.split(key)
    feature_map = jax.random.normal(kf, (B, C_IN, NY, NX), jnp.float32)
    params = init_params(kw, C_IN, NUM_CLASSES, NUM_YAW, BOX_DOF)

    cls_map, reg_map = jax.block_until_ready(
        proposal_layer_forward(
            feature_map, params,
            num_classes=NUM_CLASSES, num_yaw=NUM_YAW, box_dof=BOX_DOF,
        )
    )

    # Plain-JAX reference: 1x1 conv == channel matmul, then the same reshapes.
    w_cls, b_cls, w_reg, b_reg = params
    hp = jax.lax.Precision.HIGHEST
    ref_cls = jnp.einsum("oc,bcyx->boyx", w_cls, feature_map, precision=hp) + b_cls[None, :, None, None]
    ref_reg = jnp.einsum("oc,bcyx->boyx", w_reg, feature_map, precision=hp) + b_reg[None, :, None, None]
    ref_cls = ref_cls.reshape(B, NUM_CLASSES, NUM_YAW, NY, NX)
    ref_reg = ref_reg.reshape(B, NUM_CLASSES, BOX_DOF, NUM_YAW, NY, NX).transpose(0, 1, 3, 4, 5, 2)

    assert cls_map.shape == (B, NUM_CLASSES, NUM_YAW, NY, NX)
    assert reg_map.shape == (B, NUM_CLASSES, NUM_YAW, NY, NX, BOX_DOF)
    assert jnp.allclose(cls_map, ref_cls, atol=1e-4, rtol=1e-4)
    assert jnp.allclose(reg_map, ref_reg, atol=1e-4, rtol=1e-4)

    # TODO(synk): ProposalLayer.inference (sigmoid + topk + rotated NMS + box decode) is not
    # part of forward() and is not implemented here.
    print("KERNEL_OK")
</pallas_src>

<mosaic_0001>
module attributes {stable_mosaic.version = 11 : i64} {
  func.func @_proposal_head_kernel(%arg0: i32, %arg1: memref<2x4x256xf32, #tpu.memory_space<vmem>>, %arg2: memref<2x4xf32, #tpu.memory_space<vmem>>, %arg3: memref<2x1xf32, #tpu.memory_space<vmem>>, %arg4: memref<14x4xf32, #tpu.memory_space<vmem>>, %arg5: memref<14x1xf32, #tpu.memory_space<vmem>>, %arg6: memref<2x2x256xf32, #tpu.memory_space<vmem>>, %arg7: memref<2x14x256xf32, #tpu.memory_space<vmem>>) attributes {dimension_semantics = [#tpu.dimension_semantics<parallel>], iteration_bounds = array<i64: 1>, scalar_prefetch = 0 : i64, scratch_operands = 0 : i64, tpu.core_type = #tpu.core_type<tc>, window_params = [{transform_indices = @transform_0, window_bounds = array<i64: 2, 4, 256>}, {pipeline_mode = #tpu.pipeline_mode<synchronous>, transform_indices = @transform_1, window_bounds = array<i64: 2, 4>}, {pipeline_mode = #tpu.pipeline_mode<synchronous>, transform_indices = @transform_2, window_bounds = array<i64: 2, 1>}, {pipeline_mode = #tpu.pipeline_mode<synchronous>, transform_indices = @transform_3, window_bounds = array<i64: 14, 4>}, {pipeline_mode = #tpu.pipeline_mode<synchronous>, transform_indices = @transform_4, window_bounds = array<i64: 14, 1>}, {transform_indices = @transform_5, window_bounds = array<i64: 2, 2, 256>}, {transform_indices = @transform_6, window_bounds = array<i64: 2, 14, 256>}]} {
    %c0 = arith.constant 0 : index
    %c0_0 = arith.constant 0 : index
    %0 = vector.load %arg2[%c0, %c0_0] : memref<2x4xf32, #tpu.memory_space<vmem>>, vector<2x4xf32>
    %c0_1 = arith.constant 0 : index
    %c0_2 = arith.constant 0 : index
    %1 = vector.load %arg3[%c0_1, %c0_2] : memref<2x1xf32, #tpu.memory_space<vmem>>, vector<2x1xf32>
    %c0_3 = arith.constant 0 : index
    %c0_4 = arith.constant 0 : index
    %2 = vector.load %arg4[%c0_3, %c0_4] : memref<14x4xf32, #tpu.memory_space<vmem>>, vector<14x4xf32>
    %c0_5 = arith.constant 0 : index
    %c0_6 = arith.constant 0 : index
    %3 = vector.load %arg5[%c0_5, %c0_6] : memref<14x1xf32, #tpu.memory_space<vmem>>, vector<14x1xf32>
    %c0_7 = arith.constant 0 : index
    %c0_8 = arith.constant 0 : index
    %c0_9 = arith.constant 0 : index
    %4 = vector.load %arg1[%c0_7, %c0_8, %c0_9] : memref<2x4x256xf32, #tpu.memory_space<vmem>>, vector<1x4x256xf32>
    %5 = vector.shape_cast %4 : vector<1x4x256xf32> to vector<4x256xf32>
    %cst = arith.constant dense<0.000000e+00> : vector<2x256xf32>
    %6 = tpu.matmul %0, %5, %cst {dimension_numbers = #tpu.dot_dimension_numbers<[1], [0], [0], [1], [0, 0, 1, 1], [], []>} : vector<2x4xf32>, vector<4x256xf32>, vector<2x256xf32> -> vector<2x256xf32>
    %7 = vector.broadcast %1 : vector<2x1xf32> to vector<2x256xf32>
    %8 = arith.addf %6, %7 : vector<2x256xf32>
    %c0_10 = arith.constant 0 : index
    %c0_11 = arith.constant 0 : index
    %c0_12 = arith.constant 0 : index
    %9 = vector.load %arg6[%c0_10, %c0_11, %c0_12] : memref<2x2x256xf32, #tpu.memory_space<vmem>>, vector<1x2x256xf32>
    %10 = vector.shape_cast %9 : vector<1x2x256xf32> to vector<2x256xf32>
    %11 = vector.shape_cast %8 : vector<2x256xf32> to vector<1x2x256xf32>
    tpu.vector_store %arg6[%c0_10, %c0_11, %c0_12], %11 {strides = array<i32>} : memref<2x2x256xf32, #tpu.memory_space<vmem>>, vector<1x2x256xf32>,
    %cst_13 = arith.constant dense<0.000000e+00> : vector<14x256xf32>
    %12 = tpu.matmul %2, %5, %cst_13 {dimension_numbers = #tpu.dot_dimension_numbers<[1], [0], [0], [1], [0, 0, 1, 1], [], []>} : vector<14x4xf32>, vector<4x256xf32>, vector<14x256xf32> -> vector<14x256xf32>
    %13 = vector.broadcast %3 : vector<14x1xf32> to vector<14x256xf32>
    %14 = arith.addf %12, %13 : vector<14x256xf32>
    %c0_14 = arith.constant 0 : index
    %c0_15 = arith.constant 0 : index
    %c0_16 = arith.constant 0 : index
    %15 = vector.load %arg7[%c0_14, %c0_15, %c0_16] : memref<2x14x256xf32, #tpu.memory_space<vmem>>, vector<1x14x256xf32>
    %16 = vector.shape_cast %15 : vector<1x14x256xf32> to vector<14x256xf32>
    %17 = vector.shape_cast %14 : vector<14x256xf32> to vector<1x14x256xf32>
    tpu.vector_store %arg7[%c0_14, %c0_15, %c0_16], %17 {strides = array<i32>} : memref<2x14x256xf32, #tpu.memory_space<vmem>>, vector<1x14x256xf32>,
    %c1 = arith.constant 1 : index
    %c0_17 = arith.constant 0 : index
    %c0_18 = arith.constant 0 : index
    %18 = vector.load %arg1[%c1, %c0_17, %c0_18] : memref<2x4x256xf32, #tpu.memory_space<vmem>>, vector<1x4x256xf32>
    %19 = vector.shape_cast %18 : vector<1x4x256xf32> to vector<4x256xf32>
    %cst_19 = arith.constant dense<0.000000e+00> : vector<2x256xf32>
    %20 = tpu.matmul %0, %19, %cst_19 {dimension_numbers = #tpu.dot_dimension_numbers<[1], [0], [0], [1], [0, 0, 1, 1], [], []>} : vector<2x4xf32>, vector<4x256xf32>, vector<2x256xf32> -> vector<2x256xf32>
    %21 = vector.broadcast %1 : vector<2x1xf32> to vector<2x256xf32>
    %22 = arith.addf %20, %21 : vector<2x256xf32>
    %c1_20 = arith.constant 1 : index
    %c0_21 = arith.constant 0 : index
    %c0_22 = arith.constant 0 : index
    %23 = vector.load %arg6[%c1_20, %c0_21, %c0_22] : memref<2x2x256xf32, #tpu.memory_space<vmem>>, vector<1x2x256xf32>
    %24 = vector.shape_cast %23 : vector<1x2x256xf32> to vector<2x256xf32>
    %25 = vector.shape_cast %22 : vector<2x256xf32> to vector<1x2x256xf32>
    tpu.vector_store %arg6[%c1_20, %c0_21, %c0_22], %25 {strides = array<i32>} : memref<2x2x256xf32, #tpu.memory_space<vmem>>, vector<1x2x256xf32>,
    %cst_23 = arith.constant dense<0.000000e+00> : vector<14x256xf32>
    %26 = tpu.matmul %2, %19, %cst_23 {dimension_numbers = #tpu.dot_dimension_numbers<[1], [0], [0], [1], [0, 0, 1, 1], [], []>} : vector<14x4xf32>, vector<4x256xf32>, vector<14x256xf32> -> vector<14x256xf32>
    %27 = vector.broadcast %3 : vector<14x1xf32> to vector<14x256xf32>
    %28 = arith.addf %26, %27 : vector<14x256xf32>
    %c1_24 = arith.constant 1 : index
    %c0_25 = arith.constant 0 : index
    %c0_26 = arith.constant 0 : index
    %29 = vector.load %arg7[%c1_24, %c0_25, %c0_26] : memref<2x14x256xf32, #tpu.memory_space<vmem>>, vector<1x14x256xf32>
    %30 = vector.shape_cast %29 : vector<1x14x256xf32> to vector<14x256xf32>
    %31 = vector.shape_cast %28 : vector<14x256xf32> to vector<1x14x256xf32>
    tpu.vector_store %arg7[%c1_24, %c0_25, %c0_26], %31 {strides = array<i32>} : memref<2x14x256xf32, #tpu.memory_space<vmem>>, vector<1x14x256xf32>,
    return
  }
  func.func @transform_0(%arg0: i32) -> (i32, i32, i32) {
    %c0_i32 = arith.constant 0 : i32
    %c0_i32_0 = arith.constant 0 : i32
    %c0_i32_1 = arith.constant 0 : i32
    return %c0_i32, %c0_i32_0, %arg0 : i32, i32, i32
  }
  func.func @transform_1(%arg0: i32) -> (i32, i32) {
    %c0_i32 = arith.constant 0 : i32
    %c0_i32_0 = arith.constant 0 : i32
    %c0_i32_1 = arith.constant 0 : i32
    return %c0_i32, %c0_i32_0 : i32, i32
  }
  func.func @transform_2(%arg0: i32) -> (i32, i32) {
    %c0_i32 = arith.constant 0 : i32
    %c0_i32_0 = arith.constant 0 : i32
    %c0_i32_1 = arith.constant 0 : i32
    return %c0_i32, %c0_i32_0 : i32, i32
  }
  func.func @transform_3(%arg0: i32) -> (i32, i32) {
    %c0_i32 = arith.constant 0 : i32
    %c0_i32_0 = arith.constant 0 : i32
    %c0_i32_1 = arith.constant 0 : i32
    return %c0_i32, %c0_i32_0 : i32, i32
  }
  func.func @transform_4(%arg0: i32) -> (i32, i32) {
    %c0_i32 = arith.constant 0 : i32
    %c0_i32_0 = arith.constant 0 : i32
    %c0_i32_1 = arith.constant 0 : i32
    return %c0_i32, %c0_i32_0 : i32, i32
  }
  func.func @transform_5(%arg0: i32) -> (i32, i32, i32) {
    %c0_i32 = arith.constant 0 : i32
    %c0_i32_0 = arith.constant 0 : i32
    %c0_i32_1 = arith.constant 0 : i32
    return %c0_i32, %c0_i32_0, %arg0 : i32, i32, i32
  }
  func.func @transform_6(%arg0: i32) -> (i32, i32, i32) {
    %c0_i32 = arith.constant 0 : i32
    %c0_i32_0 = arith.constant 0 : i32
    %c0_i32_1 = arith.constant 0 : i32
    return %c0_i32, %c0_i32_0, %arg0 : i32, i32, i32
  }
}

</mosaic_0001>

<bundles_post_ra>
// kernel: tpu_custom_call.1
= control target key start
LH: loop header
LB: loop body
LE: loop exit
PB: predicated region body
PF: predicated region fallthrough
CT: control target
= control target key end

     0   :  { %vm41_vm0 = vcmask 1043456   ;;  %v472_v4 = vmov 0.0   ;;  %vm37_vm1 = vcmask 31744   ;;  %v473_v6 = vmov 0   ;;  %s577_s0 = inlined_call_operand.vmem [shape: f32[2,4,256], index: 0, kind: input, shape index: {}]   ;;  %s578_s1 = inlined_call_operand.vmem [shape: f32[2,4], index: 1, kind: input, shape index: {}]   ;;  %s579_s2 = inlined_call_operand.vmem [shape: f32[2,1], index: 2, kind: input, shape index: {}]   ;;  %s580_s3 = inlined_call_operand.vmem [shape: f32[14,4], index: 3, kind: input, shape index: {}]   ;;  %s581_s4 = inlined_call_operand.vmem [shape: f32[14,1], index: 4, kind: input, shape index: {}]   ;;  %s582_s5 = inlined_call_operand.hbm [shape: f32[2,2,256], index: 5, kind: output, shape index: {0}]   ;;  %s583_s6 = inlined_call_operand.vmem [shape: f32[2,14,256], index: 6, kind: output, shape index: {1}]  }
   0x1   :  { %v29_v0 = vld [vmem:[%s577_s0] sm:$0xff]  ;;  %v428_v1 = vld [vmem:[%s577_s0 + $0x8] sm:$0xff]  ;;  %110 = vmatprep.mubr.f32.mxu1 %v472_v4  ;;  %298 = vmatprep.mubr.f32.mxu0 %v472_v4 }
   0x2   :  { %v36_v2 = vcombine.high %v29_v0, %v29_v0  ;;  %v229_v3 = vcombine.high %v428_v1, %v428_v1  ;;  %v23_v5 = vld [vmem:[%s578_s1] sm:$0x3]  ;;  %446 = vset.pattern.permute.xlu0 %v473_v6  ;;  %447 = vset.pattern.permute.xlu1 %v473_v6 }
   0x3   :  { %12 = vsyncpa [#allocation3], 0  ;;  %v25_v7 = vld [vmem:[%s580_s3] sm:$0xff]  ;;  %v28_v9 = vld [vmem:[%s581_s4 + $0x8] sm:$0x3f]  ;;  %s474_s10 = smov [#allocation2]  }
   0x4   :  { %420 = vmatprep.subr.msk.mxu1 %vm41_vm0, %v36_v2  ;;  %429 = vmatprep.subr.msk.mxu0 %vm41_vm0, %v229_v3  ;;  %v24_v8 = vld [vmem:[%s579_s2] sm:$0x3]  ;;  %v26_v10 = vld [vmem:[%s580_s3 + $0x8] sm:$0x3f]  ;;  %s405_s11 = sshll.u32 %s474_s10, 4  ;;  %s406_s11 = int_to_ptr.vmem [resolvable:$true] %s405_s11 }
   0x5   :  { %421 = vmatpush1.msk.msra.mxu1 %vm41_vm0, %v29_v0  ;;  %430 = vmatpush1.msk.msra.mxu0 %vm41_vm0, %v428_v1  ;;  %v27_v11 = vld [vmem:[%s581_s4] sm:$0xff]  ;;  %s450_s16 = scalar_lea.vmem %s406_s11, 128  ;;  %p455_p1 = scmp.lt.s32.totalorder %s406_s11, %s406_s11 }
   0x6   :  { %422 = vmatmul.mubr.msk.f32.vlgmr.msra.gmra.mxu1 %vm37_vm1, %v23_v5  ;;  %424 = vmatprep.subr.msk.mxu1 %vm41_vm0, %v36_v2  ;;  %p451_p0 = scmp.ne.s32.totalorder %s406_s11, %s450_s16  ;;  %p456_p2 = scmp.lt.s32.totalorder %s450_s16, %s450_s16 }
   0x7   :  { %431 = vmatmul.mubr.msk.f32.vlgmr.msra.gmra.mxu0 %vm37_vm1, %v23_v5  ;;  %433 = vmatprep.subr.msk.mxu0 %vm41_vm0, %v229_v3 }
   0x8   :  { %425 = vmatpush1.msk.msra.mxu1 %vm41_vm0, %v29_v0  ;;  %434 = vmatpush1.msk.msra.mxu0 %vm41_vm0, %v428_v1  ;;  %p457_p3 = por %p456_p2, %p455_p1 }
   0x9   :  { %209 = vmatprep.mubr.f32.mxu1 %v472_v4  ;;  %382 = vmatprep.mubr.f32.mxu0 %v472_v4 }
   0xa   :  { %426 = vmatmul.mubr.msk.f32.vlgmr.msra.gmra.mxu1 %vm37_vm1, %v25_v7  ;;  %32 = vperm.xlu0 %446, %v24_v8   ;;  %p458_p4 = pnand %p457_p3, %p451_p0 }
   0xb   :  { %435 = vmatmul.mubr.msk.f32.vlgmr.msra.gmra.mxu0 %vm37_vm1, %v25_v7  ;;  %215 = vmatprep.mubr.f32.mxu1 %v472_v4 }
   0xc   :  { %388 = vmatprep.mubr.f32.mxu0 %v472_v4  ;;  %136 = vperm.xlu1 %447, %v28_v9  }
   0xe   :  { %427 = vmatmul.mubr.msk.f32.gmra.mxu1 %vm37_vm1, %v26_v10  ;;  %131 = vperm.xlu0 %446, %v27_v11  }
   0xf   :  { %436 = vmatmul.mubr.msk.f32.gmra.mxu0 %vm37_vm1, %v26_v10 }
  0x85   :  { %v33_v12 = vpop.permute.xlu0 %32 }
  0x87   :  { %v137_v29 = vpop.permute.xlu1 %136 }
  0x89   :  { %v132_v16 = vpop.permute.xlu0 %131 }
  0xc6   :  { %v112_v13 = vpop.f32.mrf.mxu1 }
  0xc7   :  { %v300_v14 = vpop.f32.mrf.mxu0  ;;  %v113_v17 = vadd.f32 %v112_v13, %v33_v12 }
  0xc8   :  { %v114_v15 = vpop.f32.mrf.mxu1  ;;  %v301_v20 = vadd.f32 %v300_v14, %v33_v12 }
  0xc9   :  { %v115_v18 = vadd.f32 %v114_v15, %v33_v12  ;;  %v302_v19 = vpop.f32.mrf.mxu0 }
  0xca   :  { %v303_v21 = vadd.f32 %v302_v19, %v33_v12  ;;  %v211_v22 = vpop.f32.mrf.mxu1 }
  0xcb   :  { %v119_v23 = vcombine.low %v113_v17, %v115_v18  ;;  %v384_v24 = vpop.f32.mrf.mxu0  ;;  %v212_v25 = vadd.f32 %v211_v22, %v132_v16 }
  0xcc   :  { %v307_v26 = vcombine.low %v301_v20, %v303_v21  ;;  %v385_v27 = vadd.f32 %v384_v24, %v132_v16  ;;  %v213_v28 = vpop.f32.mrf.mxu1 }
  0xcd   :  { %423 = vst.sshfl [vmem:[#allocation2] sm:$0x33 pattern:$0x76325410] %v119_v23  ;;  %222 = vst [vmem:[%s583_s6] sm:$0xff] %v212_v25  ;;  %v214_v30 = vadd.f32 %v213_v28, %v132_v16  ;;  %v386_v31 = vpop.f32.mrf.mxu0 }
  0xce   :  { %432 = vst.sshfl [vmem:[#allocation2 + $0x4] sm:$0x33 pattern:$0x76325410] %v307_v26  ;;  %437 = vst [vmem:[%s583_s6 + $0x20] sm:$0xff] %v385_v27  ;;  %v387_v32 = vadd.f32 %v386_v31, %v132_v16  ;;  %v217_v33 = vpop.f32.mrf.mxu1 }
  0xcf   :  { %223 = vst [vmem:[%s583_s6 + $0x8] sm:$0xff] %v214_v30  ;;  %v390_v34 = vpop.f32.mrf.mxu0  ;;  %v218_v35 = vadd.f32 %v217_v33, %v137_v29 }
  0xd0   :  { %461 = shalt.err (!%p458_p4)
}
  0xd1   :  { %s475_s17 = smov 64   ;;  %s476_s18 = smov 4   ;;  %438 = vst [vmem:[%s583_s6 + $0x28] sm:$0xff] %v387_v32  ;;  %v391_v36 = vadd.f32 %v390_v34, %v137_v29  ;;  %v219_v37 = vpop.f32.mrf.mxu1  ;;  %224 = vst [vmem:[%s583_s6 + $0x10] sm:$0x3f] %v218_v35  ;;  %v392_v39 = vpop.f32.mrf.mxu0 }
  0xd2   :  { %411 = dma.vmem_to_hbm [thread:$0]  %s406_s11, 128, %s582_s5, [#allocation3], %s475_s17, %s475_s17, %s476_s18   ;;  %v220_v38 = vadd.f32 %v219_v37, %v137_v29  ;;  %v393_v40 = vadd.f32 %v392_v39, %v137_v29 }
  0xd3   :  { %439 = vst [vmem:[%s583_s6 + $0x30] sm:$0x3f] %v391_v36 }
  0xd4   :  { %225 = vst [vmem:[%s583_s6 + $0x18] sm:$0x3f] %v220_v38  ;;  %440 = vst [vmem:[%s583_s6 + $0x38] sm:$0x3f] %v393_v40 }
  0xd5   :  { %470 = dma.done.wait [#allocation3], 128  }
  0xd6   :  { %471 = vsyncadd [#allocation3], 4294967168 }
  0xd7   :  { %419 = vsyncpa [#allocation3], 1 }

</bundles_post_ra>
